<compile_context>
chip_gen: v7x
topology: tpu7x:2x2x1
jax: 0.10.0
libtpu: 0.0.40
codegen_flags: <defaults>
</compile_context>

<pallas_src>
import functools

import numpy as np
import jax
import jax.numpy as jnp
from jax import lax
from jax.experimental import pallas as pl
from jax.experimental.pallas import tpu as pltpu

EPS = 1e-5  # BatchNorm2d default eps


# ----------------------------------------------------------------------------
# Pallas kernel: row upsample + implicit concat (split banded weights)
# + conv1(+BN1 folded)+ReLU + conv2(+BN2 folded)+ReLU.  One grid step / batch.
# All activations are 2-D (H, W*C) slabs (W*C on the lane axis).
# ----------------------------------------------------------------------------
def _decoder_block_kernel(
    x_ref, skip_ref, uh_ref,
    m1u_ref, m1s_ref, m2_ref, bias_ref,
    out_ref,
    pad_up_ref, pad_skip_ref, pad_mid_ref,
    *, Hout, Wout, Cout,
):
    f32 = jnp.float32
    bf16 = jnp.bfloat16

    # Zero only the 1-row top/bottom halos; the interiors are fully rewritten
    # every grid step, so steps are independent ("parallel" batch axis).
    for ref in (pad_up_ref, pad_skip_ref, pad_mid_ref):
        zrow = jnp.zeros((1, ref.shape[1]), f32)
        ref[0:1, :] = zrow
        ref[Hout + 1:Hout + 2, :] = zrow

    # 1) Row-direction bilinear upsample (Uh @ x), scale=2, align_corners=True.
    #    The width-direction upsample kron(Uw, I_Cin) is folded into the conv1
    #    "up" band weights on the host.
    y1 = jnp.dot(uh_ref[...], x_ref[...], preferred_element_type=f32)  # (Hout, Win*Cin)

    # 2) torch.cat([up, skip], dim=1) handled implicitly: the two channel
    #    groups live in separate slabs and the conv1 weights are pre-split.
    pad_up_ref[1:Hout + 1, :] = y1
    pad_skip_ref[1:Hout + 1, :] = skip_ref[...]

    # 3) conv1 (3x3, pad 1) with folded BN1 + ReLU: three row-shifted bf16
    #    matmuls per channel group against banded (kw taps + width zero-pad
    #    folded) weights; f32 accumulation.
    acc = jnp.zeros((Hout, Wout * Cout), f32)
    for kh in range(3):
        acc += jnp.dot(pad_up_ref[kh:kh + Hout, :].astype(bf16), m1u_ref[kh],
                       preferred_element_type=f32)
        acc += jnp.dot(pad_skip_ref[kh:kh + Hout, :].astype(bf16), m1s_ref[kh],
                       preferred_element_type=f32)
    y = jnp.maximum(acc + bias_ref[0:1, :], 0.0)
    # Dropout2d: identity at inference.

    # 4) conv2 (3x3, pad 1) with folded BN2 + ReLU.
    pad_mid_ref[1:Hout + 1, :] = y
    acc2 = jnp.zeros((Hout, Wout * Cout), f32)
    for kh in range(3):
        acc2 += jnp.dot(pad_mid_ref[kh:kh + Hout, :].astype(bf16), m2_ref[kh],
                        preferred_element_type=f32)
    # Lane-dense output block: last dim = Wout*Cout (multiple of 128).
    out_ref[...] = jnp.maximum(acc2 + bias_ref[1:2, :], 0.0)


# ----------------------------------------------------------------------------
# Host-side helpers: interpolation operators, BN folding, banded conv weights.
# ----------------------------------------------------------------------------
def bilinear_matrix(n_in, n_out):
    """Row-stochastic 1-D bilinear interpolation matrix (align_corners=True)."""
    out = np.arange(n_out, dtype=np.float64)
    pos = out * (n_in - 1) / (n_out - 1) if n_out > 1 else np.zeros_like(out)
    lo = np.clip(np.floor(pos).astype(np.int64), 0, max(n_in - 2, 0))
    frac = pos - lo
    U = np.zeros((n_out, n_in), dtype=np.float64)
    U[np.arange(n_out), lo] += 1.0 - frac
    U[np.arange(n_out), np.minimum(lo + 1, n_in - 1)] += frac
    return jnp.asarray(U, dtype=jnp.float32)


def band_conv_weights(w_hwio, W):
    """(3, 3, Ci, Co) HWIO kernel -> (3, W*Ci, W*Co) banded matrices.

    For row-shift kh, M[kh] maps an (H, W*Ci) activation row directly to an
    (H, W*Co) output row, folding the kw taps, the channel projection, and the
    width zero-padding (out-of-range taps are dropped).
    """
    Ci, Co = w_hwio.shape[2], w_hwio.shape[3]
    wi = np.arange(W)[:, None]                           # input width index
    wo = np.arange(W)[None, :]                           # output width index
    sel = np.stack([(wi == wo + kw - 1) for kw in range(3)], axis=0)
    sel = jnp.asarray(sel.astype(np.float32))            # (3, W, W): [kw, wi, wo]
    M = jnp.einsum("kio,hkcd->hicod", sel, w_hwio)       # (3, W, Ci, W, Co)
    return M.reshape(3, W * Ci, W * Co)


def decoder_block_forward(x_nchw, skip_nchw, params):
    B, Cin, Hin, Win = x_nchw.shape
    _, Cs, Hout, Wout = skip_nchw.shape
    assert Hout == 2 * Hin and Wout == 2 * Win
    Cout = params["w1"].shape[-1]

    # NHWC, then flatten (W, C) onto the lane axis -> (B, H, W*C) slabs.
    x2 = jnp.transpose(x_nchw, (0, 2, 3, 1)).reshape(B, Hin, Win * Cin)
    x2 = x2.astype(jnp.float32)
    skip2 = jnp.transpose(skip_nchw, (0, 2, 3, 1)).reshape(B, Hout, Wout * Cs)
    skip2 = skip2.astype(jnp.float32)

    # Separable bilinear operators (align_corners=True).
    Uh = bilinear_matrix(Hin, Hout)                                    # (Hout, Hin)
    Uw = bilinear_matrix(Win, Wout)                                    # (Wout, Win)
    UwT_c = jnp.kron(Uw, jnp.eye(Cin, dtype=jnp.float32)).T            # (Win*Cin, Wout*Cin)

    # Fold conv bias + BatchNorm (eval mode) into the conv weights/bias.
    s1 = params["g1"] * lax.rsqrt(params["v1"] + EPS)
    w1f = params["w1"] * s1                                            # (3,3,Cin+Cs,Cout)
    b1f = (params["b1"] - params["m1"]) * s1 + params["beta1"]
    s2 = params["g2"] * lax.rsqrt(params["v2"] + EPS)
    w2f = params["w2"] * s2
    b2f = (params["b2"] - params["m2"]) * s2 + params["beta2"]

    # Banded, channel-group-split, bf16 conv weights; packed bias rows.  The
    # width-direction upsample is folded into the "up" group of conv1.
    m1u = jnp.einsum("ik,hkn->hin", UwT_c,
                     band_conv_weights(w1f[:, :, :Cin, :], Wout))      # (3, Win*Cin, Wout*Cout)
    m1u = m1u.astype(jnp.bfloat16)
    m1s = band_conv_weights(w1f[:, :, Cin:, :], Wout).astype(jnp.bfloat16)
    m2 = band_conv_weights(w2f, Wout).astype(jnp.bfloat16)
    bias = jnp.stack([jnp.tile(b1f, Wout), jnp.tile(b2f, Wout)], axis=0)
    bias = bias.astype(jnp.float32)                                    # (2, Wout*Cout)

    kernel = functools.partial(_decoder_block_kernel, Hout=Hout, Wout=Wout, Cout=Cout)

    def full_spec(arr):
        n = arr.ndim
        return pl.BlockSpec(arr.shape, lambda *_: (0,) * n)

    out2 = pl.pallas_call(
        kernel,
        out_shape=jax.ShapeDtypeStruct((B, Hout, Wout * Cout), jnp.float32),
        grid=(B,),
        in_specs=[
            pl.BlockSpec((None, Hin, Win * Cin), lambda b: (b, 0, 0)),
            pl.BlockSpec((None, Hout, Wout * Cs), lambda b: (b, 0, 0)),
            full_spec(Uh),
            full_spec(m1u),
            full_spec(m1s),
            full_spec(m2),
            full_spec(bias),
        ],
        out_specs=pl.BlockSpec((None, Hout, Wout * Cout), lambda b: (b, 0, 0)),
        scratch_shapes=[
            pltpu.VMEM((Hout + 2, Win * Cin), jnp.float32),    # row-padded up slab
            pltpu.VMEM((Hout + 2, Wout * Cs), jnp.float32),    # row-padded skip slab
            pltpu.VMEM((Hout + 2, Wout * Cout), jnp.float32),  # row-padded mid slab
        ],
        # Grid steps are independent (halo rows re-zeroed each step), so the
        # batch axis can be sharded across cores on megacore parts (v7x).
        compiler_params=pltpu.CompilerParams(dimension_semantics=("parallel",)),
    )(x2, skip2, Uh, m1u, m1s, m2, bias)

    # (B, Hout, Wout*Cout) -> NCHW (layout plumbing in XLA).
    return jnp.transpose(out2.reshape(B, Hout, Wout, Cout), (0, 3, 1, 2))


# ----------------------------------------------------------------------------
# Parameter init + pure-JAX reference (unfolded params -> validates folding).
# ----------------------------------------------------------------------------
def init_params(key, in_channels, skip_channels, out_channels):
    ks = jax.random.split(key, 14)
    c1_in = in_channels + skip_channels
    return {
        "w1": 0.1 * jax.random.normal(ks[0], (3, 3, c1_in, out_channels), jnp.float32),
        "b1": 0.05 * jax.random.normal(ks[1], (out_channels,), jnp.float32),
        "g1": 1.0 + 0.1 * jax.random.normal(ks[2], (out_channels,), jnp.float32),
        "beta1": 0.05 * jax.random.normal(ks[3], (out_channels,), jnp.float32),
        "m1": 0.05 * jax.random.normal(ks[4], (out_channels,), jnp.float32),
        "v1": 1.0 + 0.2 * jax.random.uniform(ks[5], (out_channels,), jnp.float32),
        "w2": 0.1 * jax.random.normal(ks[6], (3, 3, out_channels, out_channels), jnp.float32),
        "b2": 0.05 * jax.random.normal(ks[7], (out_channels,), jnp.float32),
        "g2": 1.0 + 0.1 * jax.random.normal(ks[8], (out_channels,), jnp.float32),
        "beta2": 0.05 * jax.random.normal(ks[9], (out_channels,), jnp.float32),
        "m2": 0.05 * jax.random.normal(ks[10], (out_channels,), jnp.float32),
        "v2": 1.0 + 0.2 * jax.random.uniform(ks[11], (out_channels,), jnp.float32),
    }


def reference_forward(x_nchw, skip_nchw, params):
    """Pure-JAX reference of the same (inference) semantics."""
    B, Cin, Hin, Win = x_nchw.shape
    _, Cs, Hout, Wout = skip_nchw.shape
    Uh = bilinear_matrix(Hin, Hout)
    Uw = bilinear_matrix(Win, Wout)
    x_nhwc = jnp.transpose(x_nchw, (0, 2, 3, 1))
    up = jnp.einsum("oh,bhwc->bowc", Uh, x_nhwc)
    up = jnp.einsum("pw,bowc->bopc", Uw, up)
    cat = jnp.concatenate([up, jnp.transpose(skip_nchw, (0, 2, 3, 1))], axis=-1)

    def conv_bn_relu(t, w, b, g, beta, m, v):
        y = lax.conv_general_dilated(t, w, (1, 1), "SAME",
                                     dimension_numbers=("NHWC", "HWIO", "NHWC"))
        y = y + b
        y = (y - m) * lax.rsqrt(v + EPS) * g + beta
        return jnp.maximum(y, 0.0)

    y = conv_bn_relu(cat, params["w1"], params["b1"], params["g1"],
                     params["beta1"], params["m1"], params["v1"])
    z = conv_bn_relu(y, params["w2"], params["b2"], params["g2"],
                     params["beta2"], params["m2"], params["v2"])
    return jnp.transpose(z, (0, 3, 1, 2))


if __name__ == "__main__":
    key = jax.random.PRNGKey(0)
    kx, ksk, kp = jax.random.split(key, 3)

    B, Cin, Cs, Cout = 2, 4, 4, 8
    Hin = Win = 8
    x = jax.random.normal(kx, (B, Cin, Hin, Win), jnp.float32)        # NCHW like PyTorch
    skip = jax.random.normal(ksk, (B, Cs, 2 * Hin, 2 * Win), jnp.float32)
    params = init_params(kp, Cin, Cs, Cout)

    out = decoder_block_forward(x, skip, params)
    out = jax.block_until_ready(out)
    assert out.shape == (B, Cout, 2 * Hin, 2 * Win)

    ref = reference_forward(x, skip, params)
    np.testing.assert_allclose(np.asarray(out), np.asarray(ref), rtol=2e-2, atol=3e-2)

    print("KERNEL_OK")
</pallas_src>

<mosaic_0001>
module attributes {stable_mosaic.version = 11 : i64} {
  func.func @_decoder_block_kernel(%arg0: i32, %arg1: memref<1x8x32xf32, #tpu.memory_space<vmem>>, %arg2: memref<1x16x64xf32, #tpu.memory_space<vmem>>, %arg3: memref<16x8xf32, #tpu.memory_space<vmem>>, %arg4: memref<3x32x128xbf16, #tpu.memory_space<vmem>>, %arg5: memref<3x64x128xbf16, #tpu.memory_space<vmem>>, %arg6: memref<3x128x128xbf16, #tpu.memory_space<vmem>>, %arg7: memref<2x128xf32, #tpu.memory_space<vmem>>, %arg8: memref<1x16x128xf32, #tpu.memory_space<vmem>>, %arg9: memref<18x32xf32, #tpu.memory_space<vmem>>, %arg10: memref<18x64xf32, #tpu.memory_space<vmem>>, %arg11: memref<18x128xf32, #tpu.memory_space<vmem>>) attributes {dimension_semantics = [#tpu.dimension_semantics<parallel>], iteration_bounds = array<i64: 2>, scalar_prefetch = 0 : i64, scratch_operands = 3 : i64, tpu.core_type = #tpu.core_type<tc>, window_params = [{transform_indices = @transform_0, window_bounds = array<i64: 1, 8, 32>}, {transform_indices = @transform_1, window_bounds = array<i64: 1, 16, 64>}, {pipeline_mode = #tpu.pipeline_mode<synchronous>, transform_indices = @transform_2, window_bounds = array<i64: 16, 8>}, {pipeline_mode = #tpu.pipeline_mode<synchronous>, transform_indices = @transform_3, window_bounds = array<i64: 3, 32, 128>}, {pipeline_mode = #tpu.pipeline_mode<synchronous>, transform_indices = @transform_4, window_bounds = array<i64: 3, 64, 128>}, {pipeline_mode = #tpu.pipeline_mode<synchronous>, transform_indices = @transform_5, window_bounds = array<i64: 3, 128, 128>}, {pipeline_mode = #tpu.pipeline_mode<synchronous>, transform_indices = @transform_6, window_bounds = array<i64: 2, 128>}, {transform_indices = @transform_7, window_bounds = array<i64: 1, 16, 128>}]} {
    %cst = arith.constant 0.000000e+00 : f32
    %0 = vector.broadcast %cst : f32 to vector<1x32xf32>
    %c0 = arith.constant 0 : index
    %c0_0 = arith.constant 0 : index
    %1 = vector.load %arg9[%c0, %c0_0] : memref<18x32xf32, #tpu.memory_space<vmem>>, vector<1x32xf32>
    tpu.vector_store %arg9[%c0, %c0_0], %0 {strides = array<i32>} : memref<18x32xf32, #tpu.memory_space<vmem>>, vector<1x32xf32>,
    %c17 = arith.constant 17 : index
    %c0_1 = arith.constant 0 : index
    %2 = vector.load %arg9[%c17, %c0_1] : memref<18x32xf32, #tpu.memory_space<vmem>>, vector<1x32xf32>
    tpu.vector_store %arg9[%c17, %c0_1], %0 {strides = array<i32>} : memref<18x32xf32, #tpu.memory_space<vmem>>, vector<1x32xf32>,
    %cst_2 = arith.constant 0.000000e+00 : f32
    %3 = vector.broadcast %cst_2 : f32 to vector<1x64xf32>
    %c0_3 = arith.constant 0 : index
    %c0_4 = arith.constant 0 : index
    %4 = vector.load %arg10[%c0_3, %c0_4] : memref<18x64xf32, #tpu.memory_space<vmem>>, vector<1x64xf32>
    tpu.vector_store %arg10[%c0_3, %c0_4], %3 {strides = array<i32>} : memref<18x64xf32, #tpu.memory_space<vmem>>, vector<1x64xf32>,
    %c17_5 = arith.constant 17 : index
    %c0_6 = arith.constant 0 : index
    %5 = vector.load %arg10[%c17_5, %c0_6] : memref<18x64xf32, #tpu.memory_space<vmem>>, vector<1x64xf32>
    tpu.vector_store %arg10[%c17_5, %c0_6], %3 {strides = array<i32>} : memref<18x64xf32, #tpu.memory_space<vmem>>, vector<1x64xf32>,
    %cst_7 = arith.constant 0.000000e+00 : f32
    %6 = vector.broadcast %cst_7 : f32 to vector<1x128xf32>
    %c0_8 = arith.constant 0 : index
    %c0_9 = arith.constant 0 : index
    %7 = vector.load %arg11[%c0_8, %c0_9] : memref<18x128xf32, #tpu.memory_space<vmem>>, vector<1x128xf32>
    tpu.vector_store %arg11[%c0_8, %c0_9], %6 {strides = array<i32>} : memref<18x128xf32, #tpu.memory_space<vmem>>, vector<1x128xf32>,
    %c17_10 = arith.constant 17 : index
    %c0_11 = arith.constant 0 : index
    %8 = vector.load %arg11[%c17_10, %c0_11] : memref<18x128xf32, #tpu.memory_space<vmem>>, vector<1x128xf32>
    tpu.vector_store %arg11[%c17_10, %c0_11], %6 {strides = array<i32>} : memref<18x128xf32, #tpu.memory_space<vmem>>, vector<1x128xf32>,
    %c0_12 = arith.constant 0 : index
    %c0_13 = arith.constant 0 : index
    %9 = vector.load %arg3[%c0_12, %c0_13] : memref<16x8xf32, #tpu.memory_space<vmem>>, vector<16x8xf32>
    %c0_14 = arith.constant 0 : index
    %c0_15 = arith.constant 0 : index
    %c0_16 = arith.constant 0 : index
    %10 = vector.load %arg1[%c0_14, %c0_15, %c0_16] : memref<1x8x32xf32, #tpu.memory_space<vmem>>, vector<1x8x32xf32>
    %11 = vector.shape_cast %10 : vector<1x8x32xf32> to vector<8x32xf32>
    %cst_17 = arith.constant dense<0.000000e+00> : vector<16x32xf32>
    %12 = tpu.matmul %9, %11, %cst_17 {dimension_numbers = #tpu.dot_dimension_numbers<[1], [0], [0], [1], [0, 0, 1, 1], [], []>} : vector<16x8xf32>, vector<8x32xf32>, vector<16x32xf32> -> vector<16x32xf32>
    %c1 = arith.constant 1 : index
    %c0_18 = arith.constant 0 : index
    %13 = vector.load %arg9[%c1, %c0_18] : memref<18x32xf32, #tpu.memory_space<vmem>>, vector<16x32xf32>
    tpu.vector_store %arg9[%c1, %c0_18], %12 {strides = array<i32>} : memref<18x32xf32, #tpu.memory_space<vmem>>, vector<16x32xf32>,
    %c0_19 = arith.constant 0 : index
    %c0_20 = arith.constant 0 : index
    %c0_21 = arith.constant 0 : index
    %14 = vector.load %arg2[%c0_19, %c0_20, %c0_21] : memref<1x16x64xf32, #tpu.memory_space<vmem>>, vector<1x16x64xf32>
    %15 = vector.shape_cast %14 : vector<1x16x64xf32> to vector<16x64xf32>
    %c1_22 = arith.constant 1 : index
    %c0_23 = arith.constant 0 : index
    %16 = vector.load %arg10[%c1_22, %c0_23] : memref<18x64xf32, #tpu.memory_space<vmem>>, vector<16x64xf32>
    tpu.vector_store %arg10[%c1_22, %c0_23], %15 {strides = array<i32>} : memref<18x64xf32, #tpu.memory_space<vmem>>, vector<16x64xf32>,
    %cst_24 = arith.constant 0.000000e+00 : f32
    %17 = vector.broadcast %cst_24 : f32 to vector<16x128xf32>
    %c0_25 = arith.constant 0 : index
    %c0_26 = arith.constant 0 : index
    %18 = vector.load %arg9[%c0_25, %c0_26] : memref<18x32xf32, #tpu.memory_space<vmem>>, vector<16x32xf32>
    %19 = arith.truncf %18 : vector<16x32xf32> to vector<16x32xbf16>
    %c0_27 = arith.constant 0 : index
    %c0_28 = arith.constant 0 : index
    %c0_29 = arith.constant 0 : index
    %20 = vector.load %arg4[%c0_27, %c0_28, %c0_29] : memref<3x32x128xbf16, #tpu.memory_space<vmem>>, vector<1x32x128xbf16>
    %21 = vector.shape_cast %20 : vector<1x32x128xbf16> to vector<32x128xbf16>
    %cst_30 = arith.constant dense<0.000000e+00> : vector<16x128xf32>
    %22 = tpu.matmul %19, %21, %cst_30 {dimension_numbers = #tpu.dot_dimension_numbers<[1], [0], [0], [1], [0, 0, 1, 1], [], []>} : vector<16x32xbf16>, vector<32x128xbf16>, vector<16x128xf32> -> vector<16x128xf32>
    %23 = arith.addf %17, %22 : vector<16x128xf32>
    %c0_31 = arith.constant 0 : index
    %c0_32 = arith.constant 0 : index
    %24 = vector.load %arg10[%c0_31, %c0_32] : memref<18x64xf32, #tpu.memory_space<vmem>>, vector<16x64xf32>
    %25 = arith.truncf %24 : vector<16x64xf32> to vector<16x64xbf16>
    %c0_33 = arith.constant 0 : index
    %c0_34 = arith.constant 0 : index
    %c0_35 = arith.constant 0 : index
    %26 = vector.load %arg5[%c0_33, %c0_34, %c0_35] : memref<3x64x128xbf16, #tpu.memory_space<vmem>>, vector<1x64x128xbf16>
    %27 = vector.shape_cast %26 : vector<1x64x128xbf16> to vector<64x128xbf16>
    %cst_36 = arith.constant dense<0.000000e+00> : vector<16x128xf32>
    %28 = tpu.matmul %25, %27, %cst_36 {dimension_numbers = #tpu.dot_dimension_numbers<[1], [0], [0], [1], [0, 0, 1, 1], [], []>} : vector<16x64xbf16>, vector<64x128xbf16>, vector<16x128xf32> -> vector<16x128xf32>
    %29 = arith.addf %23, %28 : vector<16x128xf32>
    %c1_37 = arith.constant 1 : index
    %c0_38 = arith.constant 0 : index
    %30 = vector.load %arg9[%c1_37, %c0_38] : memref<18x32xf32, #tpu.memory_space<vmem>>, vector<16x32xf32>
    %31 = arith.truncf %30 : vector<16x32xf32> to vector<16x32xbf16>
    %c1_39 = arith.constant 1 : index
    %c0_40 = arith.constant 0 : index
    %c0_41 = arith.constant 0 : index
    %32 = vector.load %arg4[%c1_39, %c0_40, %c0_41] : memref<3x32x128xbf16, #tpu.memory_space<vmem>>, vector<1x32x128xbf16>
    %33 = vector.shape_cast %32 : vector<1x32x128xbf16> to vector<32x128xbf16>
    %cst_42 = arith.constant dense<0.000000e+00> : vector<16x128xf32>
    %34 = tpu.matmul %31, %33, %cst_42 {dimension_numbers = #tpu.dot_dimension_numbers<[1], [0], [0], [1], [0, 0, 1, 1], [], []>} : vector<16x32xbf16>, vector<32x128xbf16>, vector<16x128xf32> -> vector<16x128xf32>
    %35 = arith.addf %29, %34 : vector<16x128xf32>
    %c1_43 = arith.constant 1 : index
    %c0_44 = arith.constant 0 : index
    %36 = vector.load %arg10[%c1_43, %c0_44] : memref<18x64xf32, #tpu.memory_space<vmem>>, vector<16x64xf32>
    %37 = arith.truncf %36 : vector<16x64xf32> to vector<16x64xbf16>
    %c1_45 = arith.constant 1 : index
    %c0_46 = arith.constant 0 : index
    %c0_47 = arith.constant 0 : index
    %38 = vector.load %arg5[%c1_45, %c0_46, %c0_47] : memref<3x64x128xbf16, #tpu.memory_space<vmem>>, vector<1x64x128xbf16>
    %39 = vector.shape_cast %38 : vector<1x64x128xbf16> to vector<64x128xbf16>
    %cst_48 = arith.constant dense<0.000000e+00> : vector<16x128xf32>
    %40 = tpu.matmul %37, %39, %cst_48 {dimension_numbers = #tpu.dot_dimension_numbers<[1], [0], [0], [1], [0, 0, 1, 1], [], []>} : vector<16x64xbf16>, vector<64x128xbf16>, vector<16x128xf32> -> vector<16x128xf32>
    %41 = arith.addf %35, %40 : vector<16x128xf32>
    %c2 = arith.constant 2 : index
    %c0_49 = arith.constant 0 : index
    %42 = vector.load %arg9[%c2, %c0_49] : memref<18x32xf32, #tpu.memory_space<vmem>>, vector<16x32xf32>
    %43 = arith.truncf %42 : vector<16x32xf32> to vector<16x32xbf16>
    %c2_50 = arith.constant 2 : index
    %c0_51 = arith.constant 0 : index
    %c0_52 = arith.constant 0 : index
    %44 = vector.load %arg4[%c2_50, %c0_51, %c0_52] : memref<3x32x128xbf16, #tpu.memory_space<vmem>>, vector<1x32x128xbf16>
    %45 = vector.shape_cast %44 : vector<1x32x128xbf16> to vector<32x128xbf16>
    %cst_53 = arith.constant dense<0.000000e+00> : vector<16x128xf32>
    %46 = tpu.matmul %43, %45, %cst_53 {dimension_numbers = #tpu.dot_dimension_numbers<[1], [0], [0], [1], [0, 0, 1, 1], [], []>} : vector<16x32xbf16>, vector<32x128xbf16>, vector<16x128xf32> -> vector<16x128xf32>
    %47 = arith.addf %41, %46 : vector<16x128xf32>
    %c2_54 = arith.constant 2 : index
    %c0_55 = arith.constant 0 : index
    %48 = vector.load %arg10[%c2_54, %c0_55] : memref<18x64xf32, #tpu.memory_space<vmem>>, vector<16x64xf32>
    %49 = arith.truncf %48 : vector<16x64xf32> to vector<16x64xbf16>
    %c2_56 = arith.constant 2 : index
    %c0_57 = arith.constant 0 : index
    %c0_58 = arith.constant 0 : index
    %50 = vector.load %arg5[%c2_56, %c0_57, %c0_58] : memref<3x64x128xbf16, #tpu.memory_space<vmem>>, vector<1x64x128xbf16>
    %51 = vector.shape_cast %50 : vector<1x64x128xbf16> to vector<64x128xbf16>
    %cst_59 = arith.constant dense<0.000000e+00> : vector<16x128xf32>
    %52 = tpu.matmul %49, %51, %cst_59 {dimension_numbers = #tpu.dot_dimension_numbers<[1], [0], [0], [1], [0, 0, 1, 1], [], []>} : vector<16x64xbf16>, vector<64x128xbf16>, vector<16x128xf32> -> vector<16x128xf32>
    %53 = arith.addf %47, %52 : vector<16x128xf32>
    %c0_60 = arith.constant 0 : index
    %c0_61 = arith.constant 0 : index
    %54 = vector.load %arg7[%c0_60, %c0_61] : memref<2x128xf32, #tpu.memory_space<vmem>>, vector<1x128xf32>
    %55 = vector.broadcast %54 : vector<1x128xf32> to vector<16x128xf32>
    %56 = arith.addf %53, %55 : vector<16x128xf32>
    %cst_62 = arith.constant 0.000000e+00 : f32
    %57 = vector.broadcast %cst_62 : f32 to vector<16x128xf32>
    %58 = arith.maximumf %56, %57 : vector<16x128xf32>
    %c1_63 = arith.constant 1 : index
    %c0_64 = arith.constant 0 : index
    %59 = vector.load %arg11[%c1_63, %c0_64] : memref<18x128xf32, #tpu.memory_space<vmem>>, vector<16x128xf32>
    tpu.vector_store %arg11[%c1_63, %c0_64], %58 {strides = array<i32>} : memref<18x128xf32, #tpu.memory_space<vmem>>, vector<16x128xf32>,
    %cst_65 = arith.constant 0.000000e+00 : f32
    %60 = vector.broadcast %cst_65 : f32 to vector<16x128xf32>
    %c0_66 = arith.constant 0 : index
    %c0_67 = arith.constant 0 : index
    %61 = vector.load %arg11[%c0_66, %c0_67] : memref<18x128xf32, #tpu.memory_space<vmem>>, vector<16x128xf32>
    %62 = arith.truncf %61 : vector<16x128xf32> to vector<16x128xbf16>
    %c0_68 = arith.constant 0 : index
    %c0_69 = arith.constant 0 : index
    %c0_70 = arith.constant 0 : index
    %63 = vector.load %arg6[%c0_68, %c0_69, %c0_70] : memref<3x128x128xbf16, #tpu.memory_space<vmem>>, vector<1x128x128xbf16>
    %64 = vector.shape_cast %63 : vector<1x128x128xbf16> to vector<128x128xbf16>
    %cst_71 = arith.constant dense<0.000000e+00> : vector<16x128xf32>
    %65 = tpu.matmul %62, %64, %cst_71 {dimension_numbers = #tpu.dot_dimension_numbers<[1], [0], [0], [1], [0, 0, 1, 1], [], []>} : vector<16x128xbf16>, vector<128x128xbf16>, vector<16x128xf32> -> vector<16x128xf32>
    %66 = arith.addf %60, %65 : vector<16x128xf32>
    %c1_72 = arith.constant 1 : index
    %c0_73 = arith.constant 0 : index
    %67 = vector.load %arg11[%c1_72, %c0_73] : memref<18x128xf32, #tpu.memory_space<vmem>>, vector<16x128xf32>
    %68 = arith.truncf %67 : vector<16x128xf32> to vector<16x128xbf16>
    %c1_74 = arith.constant 1 : index
    %c0_75 = arith.constant 0 : index
    %c0_76 = arith.constant 0 : index
    %69 = vector.load %arg6[%c1_74, %c0_75, %c0_76] : memref<3x128x128xbf16, #tpu.memory_space<vmem>>, vector<1x128x128xbf16>
    %70 = vector.shape_cast %69 : vector<1x128x128xbf16> to vector<128x128xbf16>
    %cst_77 = arith.constant dense<0.000000e+00> : vector<16x128xf32>
    %71 = tpu.matmul %68, %70, %cst_77 {dimension_numbers = #tpu.dot_dimension_numbers<[1], [0], [0], [1], [0, 0, 1, 1], [], []>} : vector<16x128xbf16>, vector<128x128xbf16>, vector<16x128xf32> -> vector<16x128xf32>
    %72 = arith.addf %66, %71 : vector<16x128xf32>
    %c2_78 = arith.constant 2 : index
    %c0_79 = arith.constant 0 : index
    %73 = vector.load %arg11[%c2_78, %c0_79] : memref<18x128xf32, #tpu.memory_space<vmem>>, vector<16x128xf32>
    %74 = arith.truncf %73 : vector<16x128xf32> to vector<16x128xbf16>
    %c2_80 = arith.constant 2 : index
    %c0_81 = arith.constant 0 : index
    %c0_82 = arith.constant 0 : index
    %75 = vector.load %arg6[%c2_80, %c0_81, %c0_82] : memref<3x128x128xbf16, #tpu.memory_space<vmem>>, vector<1x128x128xbf16>
    %76 = vector.shape_cast %75 : vector<1x128x128xbf16> to vector<128x128xbf16>
    %cst_83 = arith.constant dense<0.000000e+00> : vector<16x128xf32>
    %77 = tpu.matmul %74, %76, %cst_83 {dimension_numbers = #tpu.dot_dimension_numbers<[1], [0], [0], [1], [0, 0, 1, 1], [], []>} : vector<16x128xbf16>, vector<128x128xbf16>, vector<16x128xf32> -> vector<16x128xf32>
    %78 = arith.addf %72, %77 : vector<16x128xf32>
    %c1_84 = arith.constant 1 : index
    %c0_85 = arith.constant 0 : index
    %79 = vector.load %arg7[%c1_84, %c0_85] : memref<2x128xf32, #tpu.memory_space<vmem>>, vector<1x128xf32>
    %80 = vector.broadcast %79 : vector<1x128xf32> to vector<16x128xf32>
    %81 = arith.addf %78, %80 : vector<16x128xf32>
    %cst_86 = arith.constant 0.000000e+00 : f32
    %82 = vector.broadcast %cst_86 : f32 to vector<16x128xf32>
    %83 = arith.maximumf %81, %82 : vector<16x128xf32>
    %c0_87 = arith.constant 0 : index
    %c0_88 = arith.constant 0 : index
    %c0_89 = arith.constant 0 : index
    %84 = vector.load %arg8[%c0_87, %c0_88, %c0_89] : memref<1x16x128xf32, #tpu.memory_space<vmem>>, vector<1x16x128xf32>
    %85 = vector.shape_cast %84 : vector<1x16x128xf32> to vector<16x128xf32>
    %86 = vector.shape_cast %83 : vector<16x128xf32> to vector<1x16x128xf32>
    tpu.vector_store %arg8[%c0_87, %c0_88, %c0_89], %86 {strides = array<i32>} : memref<1x16x128xf32, #tpu.memory_space<vmem>>, vector<1x16x128xf32>,
    return
  }
  func.func @transform_0(%arg0: i32) -> (i32, i32, i32) {
    %c0_i32 = arith.constant 0 : i32
    %c0_i32_0 = arith.constant 0 : i32
    %c0_i32_1 = arith.constant 0 : i32
    return %arg0, %c0_i32, %c0_i32_0 : i32, i32, i32
  }
  func.func @transform_1(%arg0: i32) -> (i32, i32, i32) {
    %c0_i32 = arith.constant 0 : i32
    %c0_i32_0 = arith.constant 0 : i32
    %c0_i32_1 = arith.constant 0 : i32
    return %arg0, %c0_i32, %c0_i32_0 : i32, i32, i32
  }
  func.func @transform_2(%arg0: i32) -> (i32, i32) {
    %c0_i32 = arith.constant 0 : i32
    %c0_i32_0 = arith.constant 0 : i32
    %c0_i32_1 = arith.constant 0 : i32
    return %c0_i32, %c0_i32_0 : i32, i32
  }
  func.func @transform_3(%arg0: i32) -> (i32, i32, i32) {
    %c0_i32 = arith.constant 0 : i32
    %c0_i32_0 = arith.constant 0 : i32
    %c0_i32_1 = arith.constant 0 : i32
    %c0_i32_2 = arith.constant 0 : i32
    return %c0_i32, %c0_i32_0, %c0_i32_1 : i32, i32, i32
  }
  func.func @transform_4(%arg0: i32) -> (i32, i32, i32) {
    %c0_i32 = arith.constant 0 : i32
    %c0_i32_0 = arith.constant 0 : i32
    %c0_i32_1 = arith.constant 0 : i32
    %c0_i32_2 = arith.constant 0 : i32
    return %c0_i32, %c0_i32_0, %c0_i32_1 : i32, i32, i32
  }
  func.func @transform_5(%arg0: i32) -> (i32, i32, i32) {
    %c0_i32 = arith.constant 0 : i32
    %c0_i32_0 = arith.constant 0 : i32
    %c0_i32_1 = arith.constant 0 : i32
    %c0_i32_2 = arith.constant 0 : i32
    return %c0_i32, %c0_i32_0, %c0_i32_1 : i32, i32, i32
  }
  func.func @transform_6(%arg0: i32) -> (i32, i32) {
    %c0_i32 = arith.constant 0 : i32
    %c0_i32_0 = arith.constant 0 : i32
    %c0_i32_1 = arith.constant 0 : i32
    return %c0_i32, %c0_i32_0 : i32, i32
  }
  func.func @transform_7(%arg0: i32) -> (i32, i32, i32) {
    %c0_i32 = arith.constant 0 : i32
    %c0_i32_0 = arith.constant 0 : i32
    %c0_i32_1 = arith.constant 0 : i32
    return %arg0, %c0_i32, %c0_i32_0 : i32, i32, i32
  }
}

</mosaic_0001>

<bundles_post_ra>
// kernel: tpu_custom_call.1
= control target key start
LH: loop header
LB: loop body
LE: loop exit
PB: predicated region body
PF: predicated region fallthrough
CT: control target
= control target key end

     0   :  { %12 = vsyncpa [#allocation6], 0  ;;  %s2369_s0 = inlined_call_operand.vmem [shape: f32[2,8,32], index: 0, kind: input, shape index: {}]   ;;  %s2370_s1 = inlined_call_operand.hbm [shape: f32[2,16,64], index: 1, kind: input, shape index: {}]   ;;  %s2371_s2 = inlined_call_operand.vmem [shape: f32[16,8], index: 2, kind: input, shape index: {}]   ;;  %s2372_s3 = inlined_call_operand.hbm [shape: bf16[3,32,128], index: 3, kind: input, shape index: {}]   ;;  %s2373_s4 = inlined_call_operand.hbm [shape: bf16[3,64,128], index: 4, kind: input, shape index: {}]   ;;  %s2374_s5 = inlined_call_operand.hbm [shape: bf16[3,128,128], index: 5, kind: input, shape index: {}]   ;;  %s2375_s6 = inlined_call_operand.vmem [shape: f32[2,128], index: 6, kind: input, shape index: {}]   ;;  %s2376_s7 = inlined_call_operand.hbm [shape: f32[2,16,128], index: 7, kind: output, shape index: {}]  }
   0x1   :  { %14 = vsyncpa [#allocation6 + $0x1], 0 }
   0x2   :  { %15 = vsyncpa [#allocation9], 0 }
   0x3   :  { %16 = vsyncpa [#allocation12], 0 }
   0x4   :  { %17 = vsyncpa [#allocation7], 0 }
   0x5   :  { %19 = vsyncpa [#allocation7 + $0x1], 0  ;;  %s2000_s24 = smov 0   ;;  %s2002_s25 = smov 0  }
   0x6   :  { %s2004_s26 = smov 0   ;;  %s2006_s27 = smov 0  }
   0x7 LB: > { %s2021_s28 = sadd.s32 4294967295, %s1945_s27   ;;  %s1376_s29 = sadd.s32 4294967294, %s1945_s27   ;;  %s1945_s27 = sphi %s2006_s27, %s2402_s27   ;;  %s1941_s26 = sphi %s2004_s26, %s2401_s26   ;;  %s1937_s25 = sphi %s2002_s25, %s2400_s25   ;;  %s1933_s24 = sphi %s2000_s24, %s2399_s24  }
   0x8   : > { %p71_p0 = scmp.ne.s32.totalorder %s1937_s25, %s1933_s24  ;;  %p2377_p1 = scmp.eq.s32.totalorder %s2021_s28, 0 }
   0x9   : > { %p206_p3 = scmp.eq.s32.totalorder %s1376_s29, 1  ;;  %p1377_p5 = scmp.ge.s32.totalorder %s1945_s27, 1 }
   0xa   : > { %p2030_p4 = por %p2377_p1, %p71_p0  ;;  %p213_p7 = scmp.lt.s32.totalorder %s1945_s27, 3 }
   0xb   : > { %p2035_p6 = por %p206_p3, %p71_p0  ;;  %s1947_s10 = smov [#allocation8]  }
   0xc   : > { %s2381_s30 = scalar_select %p2030_p4, 1, 0 }
   0xd   : > { %s2382_s8 = scalar_select %p2035_p6, 1, 0 }
   0xe   : > { %p2040_p8 = pnand %p1377_p5, %p213_p7  ;;  %s228_s11 = sshll.u32 %s1947_s10, 4  ;;  %s2044_s11 = int_to_ptr.vmem [resolvable:$true] %s228_s11 }
   0xf   : > { %2383 = sst [smem:[#allocation18_spill]] %s2382_s8  ;;  %s1948_s13 = smov [#allocation10]  }
  0x10   : > { %s2384_s9 = scalar_select %p2040_p8, 1, 0 }
  0x11   : > { %p1646_p9 = pneg %p2040_p8  ;;  %s241_s14 = sshll.u32 %s1948_s13, 4  ;;  %s2055_s14 = int_to_ptr.vmem [resolvable:$true] %s241_s14 }
  0x12   : > { %s1949_s15 = smov [#allocation11]   ;;  %s1757_s19 = scalar_lea.hbm %s2372_s3, 768 }
  0x13   : > { %p2051_p11 = pnand %p1646_p9, %p2377_p1  ;;  %s2057_s16 = sshll.u32 %s1949_s15, 4  ;;  %s255_s16 = int_to_ptr.vmem [resolvable:$true] %s2057_s16 }
  0x14   : > { %p1758_p12 = scmp.ne.s32.totalorder %s2372_s3, %s1757_s19  ;;  %p1764_p5 = scmp.lt.u32.totalorder %s1757_s19, %s2372_s3 }
  0x15   : > { %p2067_p13 = pneg %p2051_p11 }
  0x17   : > { %p1760_p0 = pnand %p2067_p13, %p1758_p12 }
  0x19   : > { %p1761_p3 = pneg %p1760_p0 }
  0x1b   : > { %p1766_p7 = pnand %p1764_p5, %p1761_p3 }
  0x1d   : > { %1769 = shalt.err (!%p1766_p7)
}
  0x1e   : > { %s1770_s10 = scalar_lea.vmem %s2044_s11, 768  ;;  %p1778_p2 = scmp.lt.s32.totalorder %s2044_s11, %s2044_s11 }
  0x1f   : > { %p1771_p9 = scmp.ne.s32.totalorder %s2044_s11, %s1770_s10  ;;  %p1779_p6 = scmp.lt.s32.totalorder %s1770_s10, %s1770_s10 }
  0x21   : > { %p1773_p10 = pnand %p1771_p9, %p2067_p13  ;;  %p1780_p12 = por %p1779_p6, %p1778_p2 }
  0x23   : > { %p1774_p1 = pneg %p1773_p10 }
  0x25   : > { %p1781_p0 = pnand %p1780_p12, %p1774_p1 }
  0x27   : > { %1784 = shalt.err (!%p1781_p0)
}
  0x28   : > { %s1950_s13 = smov 64   ;;  %s1951_s15 = smov 4  }
  0x29   : > { %1649 = dma.hbm_to_vmem [thread:$0]  (!%p2051_p11), %s2372_s3, 768, %s2044_s11, [#allocation9], %s1950_s13, %s1950_s13, %s1951_s15  }
  0x2a   : > { %s1785_s21 = scalar_lea.hbm %s2373_s4, 1536 }
  0x2b   : > { %p1786_p1 = scmp.ne.s32.totalorder %s2373_s4, %s1785_s21  ;;  %p1792_p10 = scmp.lt.u32.totalorder %s1785_s21, %s2373_s4 }
  0x2d   : > { %p1788_p2 = pnand %p1786_p1, %p2067_p13 }
  0x2f   : > { %p1789_p6 = pneg %p1788_p2 }
  0x31   : > { %p1794_p3 = pnand %p1792_p10, %p1789_p6 }
  0x33   : > { %1797 = shalt.err (!%p1794_p3)
}
  0x34   : > { %s1798_s11 = scalar_lea.vmem %s2055_s14, 1536  ;;  %p1806_p12 = scmp.lt.s32.totalorder %s2055_s14, %s2055_s14 }
  0x35   : > { %p1799_p5 = scmp.ne.s32.totalorder %s2055_s14, %s1798_s11  ;;  %p1807_p0 = scmp.lt.s32.totalorder %s1798_s11, %s1798_s11 }
  0x37   : > { %p1801_p7 = pnand %p1799_p5, %p2067_p13  ;;  %p1808_p1 = por %p1807_p0, %p1806_p12 }
  0x39   : > { %p1802_p9 = pneg %p1801_p7 }
  0x3b   : > { %p1809_p2 = pnand %p1808_p1, %p1802_p9 }
  0x3d   : > { %1812 = shalt.err (!%p1809_p2)
}
  0x3e   : > { %1652 = dma.hbm_to_vmem [thread:$0]  (!%p2051_p11), %s2373_s4, 1536, %s2055_s14, [#allocation9], %s1950_s13, %s1950_s13, %s1951_s15  }
  0x3f   : > { %s1813_s20 = scalar_lea.hbm %s2374_s5, 3072 }
  0x40   : > { %p1814_p6 = scmp.ne.s32.totalorder %s2374_s5, %s1813_s20  ;;  %p1820_p5 = scmp.lt.u32.totalorder %s1813_s20, %s2374_s5 }
  0x42   : > { %p1816_p10 = pnand %p1814_p6, %p2067_p13 }
  0x44   : > { %p1817_p3 = pneg %p1816_p10 }
  0x46   : > { %p1822_p7 = pnand %p1820_p5, %p1817_p3 }
  0x48   : > { %1825 = shalt.err (!%p1822_p7)
}
  0x49   : > { %s1826_s11 = scalar_lea.vmem %s255_s16, 3072  ;;  %p1834_p1 = scmp.lt.s32.totalorder %s255_s16, %s255_s16 }
  0x4a   : > { %p1827_p9 = scmp.ne.s32.totalorder %s255_s16, %s1826_s11  ;;  %p1835_p2 = scmp.lt.s32.totalorder %s1826_s11, %s1826_s11 }
  0x4c   : > { %p1829_p12 = pnand %p1827_p9, %p2067_p13  ;;  %p1836_p4 = por %p1835_p2, %p1834_p1 }
  0x4e   : > { %p1830_p0 = pneg %p1829_p12 }
  0x50   : > { %p1837_p8 = pnand %p1836_p4, %p1830_p0 }
  0x52   : > { %1840 = shalt.err (!%p1837_p8)
}
  0x53   : > { %1655 = dma.hbm_to_vmem [thread:$0]  (!%p2051_p11), %s2374_s5, 3072, %s255_s16, [#allocation12], %s1950_s13, %s1950_s13, %s1951_s15  }
  0x54   : > { %s2140_s22 = sadd.s32 1, %s1945_s27   ;;  %s58_s17 = sadd.s32 1, %s1941_s26 }
  0x55   : > { %s55_s12 = ssub.s32 %s1945_s27, %s2140_s22  ;;  %p65_p8 = scmp.ne.s32.totalorder %s1941_s26, %s1937_s25 }
  0x56   : > { %p56_p4 = scmp.eq.s32.totalorder %s55_s12, 0  ;;  %p66_p13 = scmp.eq.s32.totalorder %s1945_s27, 0 }
  0x57   : > { %p1667_p6 = scmp.lt.s32.totalorder %s1945_s27, 2  ;;  %p2387_p3 = scmp.eq.s32.totalorder %s2021_s28, 1 }
  0x58   : > { %s2150_s18 = scalar_select %p56_p4, %s1941_s26, %s58_s17  }
  0x59   : > { %p67_p10 = por %p66_p13, %p65_p8  ;;  %p2154_p5 = por %p2387_p3, %p65_p8 }
  0x5a   : > { %s278_s20 = sand.u32 1, %s1941_s26   ;;  %s1449_s21 = sshll.u32 %s1945_s27, 8 }
  0x5b   : > { %s1382_s16 = sshll.u32 %s278_s20, 4  ;;  %s2163_s23 = scalar_lea.hbm %s2370_s1, %s1449_s21 }
  0x5c   : > { %s282_s29 = scalar_lea.vmem [#allocation5], %s1382_s16  ;;  %p2165_p11 = pnand %p1667_p6, %p67_p10 }
  0x5d   : > { %s289_s10 = sshll.u32 %s282_s29, 4  ;;  %s2171_s14 = scalar_lea.sflag [#allocation6], %s278_s20  ;;  %s2169_s10 = int_to_ptr.vmem [resolvable:$true] %s289_s10 }
  0x5e   : > { %s1841_s8 = scalar_lea.hbm %s2163_s23, 256  ;;  %p1843_p9 = pneg %p2165_p11 }
  0x5f   : > { %p1842_p7 = scmp.ne.s32.totalorder %s2163_s23, %s1841_s8  ;;  %s1846_s21 = scalar_lea.hbm %s2370_s1, 512 }
  0x60   : > { %p1847_p1 = scmp.lt.u32.totalorder %s2163_s23, %s2370_s1  ;;  %p1848_p2 = scmp.lt.u32.totalorder %s1846_s21, %s1841_s8 }
  0x61   : > { %p1844_p12 = pnand %p1843_p9, %p1842_p7  ;;  %p1850_p8 = scmp.lt.u32.totalorder %s1841_s8, %s2163_s23 }
  0x62   : > { %p1849_p4 = por %p1848_p2, %p1847_p1 }
  0x63   : > { %p1845_p0 = pneg %p1844_p12 }
  0x64   : > { %p1851_p13 = por %p1850_p8, %p1849_p4 }
  0x66   : > { %p1852_p6 = pnand %p1851_p13, %p1845_p0 }
  0x68   : > { %1855 = shalt.err (!%p1852_p6)
}
  0x69   : > { %s1856_s20 = scalar_lea.vmem %s2169_s10, 256  ;;  %s1952_s15 = smov [#allocation5]  }
  0x6a   : > { %p1857_p10 = scmp.ne.s32.totalorder %s2169_s10, %s1856_s20  ;;  %s1861_s29 = sshll.u32 %s1952_s15, 4  ;;  %s1862_s29 = int_to_ptr.vmem [resolvable:$false] %s1861_s29 }
  0x6b   : > { %s1863_s12 = scalar_lea.vmem %s1862_s29, 512  ;;  %p1864_p12 = scmp.lt.s32.totalorder %s2169_s10, %s1862_s29 }
  0x6c   : > { %p1859_p3 = pnand %p1857_p10, %p1843_p9  ;;  %p1865_p1 = scmp.lt.s32.totalorder %s1863_s12, %s1856_s20 }
  0x6e   : > { %p1860_p7 = pneg %p1859_p3  ;;  %p1866_p2 = por %p1865_p1, %p1864_p12 }
  0x70   : > { %p1867_p4 = pnand %p1866_p2, %p1860_p7 }
  0x72   : > { %1870 = shalt.err (!%p1867_p4)
}
  0x73   : > { %s1953_s8 = smov 128   ;;  %s1954_s17 = smov 8  }
  0x74   : > { %1659 = dma.hbm_to_vmem [thread:$0]  (!%p2165_p11), %s2163_s23, 256, %s2169_s10, %s2171_s14, %s1953_s8, %s1953_s8, %s1954_s17  }
  0x75   : > { %p2390_p9 = scmp.ne.s32.totalorder %s2384_s9, 0 }
  0x76   : > { %s2202_s21 = sand.u32 (!%p2390_p9), 1, %s1937_s25   ;;  %p2391_p0 = scmp.ne.s32.totalorder (!%p2390_p9), %s2381_s30, 0 }
  0x77   : > { %301 = sbr.rel (%p2390_p9) target bundleno = 887 (0x377), region = 48  ;;  %s1386_s16 = sshll.u32 (!%p2390_p9), %s2202_s21, 4 }
  0x78   : > { %s304_s13 = scalar_lea.sflag (!%p2390_p9), [#allocation6], %s2202_s21  ;;  %s2208_s20 = scalar_lea.vmem (!%p2390_p9), [#allocation5], %s1386_s16 }
  0x7e   : > { %1916 = dma.done.wait (%p2391_p0), %s304_s13, 256  }
  0x7f   : > { %1918 = vsyncadd (%p2391_p0), %s304_s13, 4294967040  ;;  %p2392_p11 = scmp.eq.s32.totalorder %s2021_s28, 0 }
  0x81   : > { %1920 = dma.done.wait (%p2392_p11), [#allocation9], 2304   ;;  %p2393_p8 = pmov %p2392_p11 }
  0x83   : > { %1922 = vsyncadd (%p2393_p8), [#allocation9], 4294964992  ;;  %p2394_p13 = pmov %p2393_p8 }
  0x84   : > { %p2395_p6 = pmov %p2393_p8 }
  0x85   : > { %1924 = dma.done.wait (%p2394_p13), [#allocation12], 3072  }
  0x86   : > { %1926 = vsyncadd (%p2395_p6), [#allocation12], 4294964224  ;;  %p354_p10 = scmp.lt.s32.totalorder %s2021_s28, 1  ;;  %v1955_v0 = vmov 0.0   ;;  %vm370_vm0 = vcmask 64512   ;;  %v367_v2 = vld [vmem:[%s2371_s2] sm:$0xff] }
  0x87   : > { %1510 = vmatprep.subr.bf16.mxu0 %v1955_v0  ;;  %365 = vst [vmem:[#allocation4] sm:$0x1] %v1955_v0  ;;  %366 = vst [vmem:[#allocation4 + $0x11] sm:$0x1] %v1955_v0  ;;  %v368_v3 = vld [vmem:[%s2371_s2 + $0x8] sm:$0xff]  ;;  %1507 = vmatprep.mubr.msk.f32.mxu1 %vm370_vm0, %v367_v2  ;;  %v1715_v4 = vld [vmem:[#allocation10] sm:$0xff]  }
  0x88   : > { %s355_s30 = scalar_select %p354_p10, %s2021_s28, 1  ;;  %1511 = vmatpush3.bf16.msra.mxu0 %v1715_v4  ;;  %v1716_v5 = vld [vmem:[#allocation10 + $0x8] sm:$0xff]   ;;  %v1717_v6 = vld [vmem:[#allocation10 + $0x10] sm:$0xff]   ;;  %v1718_v7 = vld [vmem:[#allocation10 + $0x18] sm:$0xff]   ;;  %vm362_vm1 = vcmask 516096   ;;  %vm457_vm2 = vcmask 523264  }
  0x89   : > { %1512 = vmatprep.subr.bf16.mxu0 %v1955_v0  ;;  %v455_v8 = vld [vmem:[%s2208_s20] sm:$0xff]  ;;  %v456_v9 = vld [vmem:[%s2208_s20 + $0x8] sm:$0xff]  ;;  %363 = vst.msk [vmem:[#allocation3] sm:$0x1] %vm362_vm1, %v1955_v0  ;;  %364 = vst.msk [vmem:[#allocation3 + $0x11] sm:$0x1] %vm362_vm1, %v1955_v0 }
  0x8a   : > { %s1391_s9 = sshll.u32 %s355_s30, 3  ;;  %458 = vst.msk [vmem:[#allocation3 + $0x1] sm:$0xff] %vm457_vm2, %v455_v8  ;;  %459 = vst.msk [vmem:[#allocation3 + $0x9] sm:$0xff] %vm457_vm2, %v456_v9  ;;  %vm1956_vm3 = vmmov 0   ;;  %vm359_vm4 = vcmask 253952   ;;  %v1719_v13 = vld [vmem:[#allocation8] sm:$0xff]  }
  0x8b   : > { %s357_s11 = scalar_lea.vmem %s2369_s0, %s1391_s9  ;;  %1518 = vmatprep.mubr.msk.bf16.mxu0 %vm1956_vm3, %v1955_v0  ;;  %360 = vst.msk [vmem:[#allocation2] sm:$0x1] %vm359_vm4, %v1955_v0  ;;  %361 = vst.msk [vmem:[#allocation2 + $0x11] sm:$0x1] %vm359_vm4, %v1955_v0  ;;  %v1720_v14 = vld [vmem:[#allocation10 + $0x20] sm:$0xff]   ;;  %v1721_v15 = vld [vmem:[#allocation8 + $0x8] sm:$0xff]  }
  0x8c   : > { %v369_v1 = vld [vmem:[%s357_s11] sm:$0xff]  ;;  %1513 = vmatpush3.bf16.msra.mxu0 %v1716_v5  ;;  %v1724_v17 = vld [vmem:[#allocation10 + $0x30] sm:$0xff]   ;;  %v1726_v18 = vld [vmem:[#allocation10 + $0x38] sm:$0xff]   ;;  %vm452_vm5 = vcmask 261120   ;;  %s353_s30 = scalar_lea.vmem [#allocation13], %s1386_s16  ;;  %s1450_s23 = sshll.u32 %s2021_s28, 8 }
  0x8d   : > { %1505 = vmatprep.subr.mxu1 %v369_v1  ;;  %1514 = vmatprep.subr.bf16.mxu0 %v1955_v0  ;;  %v1722_v16 = vld [vmem:[#allocation10 + $0x28] sm:$0xff]   ;;  %v1723_v26 = vld [vmem:[#allocation8 + $0x10] sm:$0xff]   ;;  %v1727_v31 = vld [vmem:[#allocation8 + $0x20] sm:$0xff]   ;;  %s1262_s9 = sshll.u32 %s353_s30, 4  ;;  %s2325_s14 = scalar_lea.hbm %s2376_s7, %s1450_s23  ;;  %s2320_s9 = int_to_ptr.vmem [resolvable:$true] %s1262_s9 }
  0x8e   : > { %1506 = vmatpush3.msra.mxu1 %v369_v1  ;;  %v1725_v28 = vld [vmem:[#allocation8 + $0x18] sm:$0xff]   ;;  %v1728_v33 = vld [vmem:[#allocation8 + $0x28] sm:$0xff]   ;;  %v1729_v36 = vld [vmem:[#allocation10 + $0x40] sm:$0xff]   ;;  %s1249_s16 = scalar_lea.sflag [#allocation7], %s2202_s21  ;;  %s1871_s15 = scalar_lea.vmem %s2320_s9, 256 }
  0x8f   : > { %1508 = vmatmul.mubr.msk.f32.vlgmr.msra.gmra.mrb[0].mxu1 %vm370_vm0, %v368_v3  ;;  %1538 = vmatprep.subr.bf16.mxu1 %v1955_v0  ;;  %v1730_v38 = vld [vmem:[#allocation10 + $0x48] sm:$0xff]   ;;  %v1731_v39 = vld [vmem:[#allocation10 + $0x50] sm:$0xff]   ;;  %v1732_v40 = vld [vmem:[#allocation10 + $0x58] sm:$0xff]   ;;  %p1872_p3 = scmp.ne.s32.totalorder %s2320_s9, %s1871_s15  ;;  %s1957_s28 = smov [#allocation13]  }
  0x90   : > { %1515 = vmatpush3.bf16.msra.mxu0 %v1717_v6  ;;  %1546 = vmatprep.mubr.msk.bf16.mxu1 %vm1956_vm3, %v1955_v0  ;;  %v1733_v48 = vld [vmem:[#allocation11 + $0x40] sm:$0xff]   ;;  %v1735_v52 = vld [vmem:[#allocation11 + $0x48] sm:$0xff]   ;;  %v1737_v54 = vld [vmem:[#allocation11 + $0x50] sm:$0xff]   ;;  %s1875_s29 = sshll.u32 %s1957_s28, 4  ;;  %s1876_s29 = int_to_ptr.vmem [resolvable:$false] %s1875_s29 }
  0x91   : > { %1516 = vmatprep.subr.bf16.mxu0 %v1955_v0  ;;  %v467_v10 = vld [vmem:[#allocation3] sm:$0xff]  ;;  %v468_v11 = vld [vmem:[#allocation3 + $0x8] sm:$0xff]  ;;  %1539 = vmatpush3.bf16.msra.mxu1 %v1720_v14  ;;  %v1739_v56 = vld [vmem:[#allocation11 + $0x58] sm:$0xff]   ;;  %p1873_p7 = pnand %p1872_p3, %p2154_p5  ;;  %s1877_s12 = scalar_lea.vmem %s1876_s29, 512 }
  0x92   : > { %v469_v12 = vpack.c.bf16 %v468_v11, %v467_v10  ;;  %1540 = vmatprep.subr.bf16.mxu1 %v1955_v0  ;;  %v668_v19 = vld [vmem:[#allocation3 + $0x1] sm:$0xff]  ;;  %v669_v20 = vld [vmem:[#allocation3 + $0x9] sm:$0xff]  ;;  %v1740_v61 = vld [vmem:[#allocation11 + $0x18] sm:$0xff]   ;;  %p1878_p1 = scmp.lt.s32.totalorder %s2320_s9, %s1876_s29  ;;  %p1879_p2 = scmp.lt.s32.totalorder %s1877_s12, %s1871_s15 }
  0x93   : > { %v670_v21 = vpack.c.bf16 %v669_v20, %v668_v19  ;;  %v816_v41 = vld [vmem:[#allocation3 + $0x2] sm:$0xff]  ;;  %v817_v42 = vld [vmem:[#allocation3 + $0xa] sm:$0xff]  ;;  %v1747_v1 = vld [vmem:[#allocation11 + $0x78] sm:$0xff]   ;;  %p1874_p12 = pneg %p1873_p7 }
  0x94   : > { %1517 = vmatpush3.bf16.msra.mxu0 %v1718_v7  ;;  %v818_v43 = vpack.c.bf16 %v817_v42, %v816_v41  ;;  %v1734_v55 = vld [vmem:[#allocation11] sm:$0xff]   ;;  %v1736_v57 = vld [vmem:[#allocation11 + $0x8] sm:$0xff]   ;;  %v1738_v58 = vld [vmem:[#allocation11 + $0x10] sm:$0xff]   ;;  %p1880_p4 = por %p1879_p2, %p1878_p1 }
  0x95   : > { %1522 = vmatprep.subr.bf16.mxu0 %v1955_v0  ;;  %1541 = vmatpush3.bf16.msra.mxu1 %v1722_v16  ;;  %v1741_v59 = vld [vmem:[#allocation11 + $0x60] sm:$0xff]   ;;  %v1743_v60 = vld [vmem:[#allocation11 + $0x68] sm:$0xff]   ;;  %v1745_v62 = vld [vmem:[#allocation11 + $0x70] sm:$0xff]  }
  0x96   : > { %1542 = vmatprep.subr.bf16.mxu1 %v1955_v0  ;;  %v1742_v63 = vld [vmem:[#allocation11 + $0x20] sm:$0xff]   ;;  %v1744_v2 = vld [vmem:[#allocation11 + $0x28] sm:$0xff]   ;;  %v1746_v3 = vld [vmem:[#allocation11 + $0x30] sm:$0xff]   ;;  %p1881_p9 = pnand %p1880_p4, %p1874_p12 }
  0x97   : > { %1519 = vmatmul.mubr.msk.bf16.vlgmr.msra.gmra.mrb[0].mxu0 %vm457_vm2, %v469_v12  ;;  %v1748_v4 = vld [vmem:[#allocation11 + $0x38] sm:$0xff]   ;;  %v1751_v41 = vld [vmem:[#allocation11 + $0x90] sm:$0xff]  }
  0x98   : > { %1526 = vmatprep.mubr.msk.bf16.mxu0 %vm1956_vm3, %v1955_v0  ;;  %1523 = vmatpush3.bf16.msra.mxu0 %v1719_v13 }
  0x99   : > { %1524 = vmatprep.subr.bf16.mxu0 %v1955_v0  ;;  %1543 = vmatpush3.bf16.msra.mxu1 %v1724_v17 }
  0x9a   : > { %1544 = vmatprep.subr.bf16.mxu1 %v1955_v0 }
  0x9c   : > { %1525 = vmatpush3.bf16.msra.mxu0 %v1721_v15 }
  0x9d   : > { %1530 = vmatprep.subr.bf16.mxu0 %v1955_v0  ;;  %1545 = vmatpush3.bf16.msra.mxu1 %v1726_v18 }
  0x9e   : > { %1570 = vmatprep.subr.bf16.mxu1 %v1955_v0 }
  0xa0   : > { %1547 = vmatmul.mubr.msk.bf16.vlgmr.msra.gmra.mrb[4].mxu1 %vm457_vm2, %v670_v21 }
  0xa1   : > { %1586 = vmatprep.mubr.msk.bf16.mxu1 %vm1956_vm3, %v1955_v0  ;;  %1571 = vmatpush3.bf16.msra.mxu1 %v1733_v48 }
  0xa2   : > { %1572 = vmatprep.subr.bf16.mxu1 %v1955_v0 }
  0xa5   : > { %1573 = vmatpush3.bf16.msra.mxu1 %v1735_v52 }
  0xa6   : > { %1574 = vmatprep.subr.bf16.mxu1 %v1955_v0 }
  0xa9   : > { %1575 = vmatpush3.bf16.msra.mxu1 %v1737_v54 }
  0xaa   : > { %1576 = vmatprep.subr.bf16.mxu1 %v1955_v0 }
  0xad   : > { %1577 = vmatpush3.bf16.msra.mxu1 %v1739_v56 }
  0xae   : > { %1578 = vmatprep.subr.bf16.mxu1 %v1955_v0 }
  0xb1   : > { %1579 = vmatpush3.bf16.msra.mxu1 %v1741_v59 }
  0xb2   : > { %1580 = vmatprep.subr.bf16.mxu1 %v1955_v0 }
  0xb5   : > { %1581 = vmatpush3.bf16.msra.mxu1 %v1743_v60 }
  0xb6   : > { %1582 = vmatprep.subr.bf16.mxu1 %v1955_v0 }
  0xb9   : > { %1583 = vmatpush3.bf16.msra.mxu1 %v1745_v62 }
  0xba   : > { %1584 = vmatprep.subr.bf16.mxu1 %v1955_v0 }
  0xbd   : > { %1585 = vmatpush3.bf16.msra.mxu1 %v1747_v1 }
  0xbe   : > { %1610 = vmatprep.subr.bf16.mxu1 %v1955_v0 }
 0x162   : > { %v1509_v22 = vpop.f32.mrb[0].mxu1 }
 0x163   : > { %454 = vst.msk [vmem:[#allocation2 + $0x9] sm:$0xff] %vm452_vm5, %v1509_v22  ;;  %v443_v23 = vpop.f32.mrb[1].mxu1 }
 0x164   : > { %453 = vst.msk [vmem:[#allocation2 + $0x1] sm:$0xff] %vm452_vm5, %v443_v23 }
 0x16a   : > { %v603_v30 = vld [vmem:[#allocation2 + $0x9] sm:$0xff]  ;;  %v539_v44 = vpop.f32.mrb[0].mxu0 }
 0x16b   : > { %v460_v24 = vld [vmem:[#allocation2] sm:$0xff]  ;;  %v461_v25 = vld [vmem:[#allocation2 + $0x8] sm:$0xff]  ;;  %v1520_v45 = vpop.f32.mrb[1].mxu0 }
 0x16c   : > { %v462_v27 = vpack.c.bf16 %v461_v25, %v460_v24  ;;  %v602_v29 = vld [vmem:[#allocation2 + $0x1] sm:$0xff]  ;;  %v751_v35 = vld [vmem:[#allocation2 + $0xa] sm:$0xff]  ;;  %v542_v46 = vpop.f32.mrb[2].mxu0 }
 0x16d   : > { %v604_v32 = vpack.c.bf16 %v603_v30, %v602_v29  ;;  %v750_v34 = vld [vmem:[#allocation2 + $0x2] sm:$0xff]  ;;  %v1521_v47 = vpop.f32.mrb[3].mxu0 }
 0x16e   : > { %1527 = vmatmul.mubr.msk.bf16.vlgmr.msra.gmra.mrb[4].mxu0 %vm452_vm5, %v462_v27  ;;  %v752_v37 = vpack.c.bf16 %v751_v35, %v750_v34  ;;  %v1754_v45 = vld [vmem:[#allocation11 + $0xa8] sm:$0xff]   ;;  %v1756_v47 = vld [vmem:[#allocation11 + $0xb8] sm:$0xff]  }
 0x16f   : > { %1531 = vmatpush3.bf16.msra.mxu0 %v1723_v26  ;;  %1534 = vmatprep.mubr.msk.bf16.mxu0 %vm1956_vm3, %v1955_v0  ;;  %v1418_v26 = vld [vmem:[%s2375_s6] ss:$0 sm:$0xff] }
 0x170   : > { %1532 = vmatprep.subr.bf16.mxu0 %v1955_v0 }
 0x173   : > { %1533 = vmatpush3.bf16.msra.mxu0 %v1725_v28  ;;  %v741_v49 = vpop.f32.mrb[4].mxu1 }
 0x174   : > { %1550 = vmatprep.subr.bf16.mxu0 %v1955_v0  ;;  %v1548_v50 = vpop.f32.mrb[5].mxu1 }
 0x175   : > { %v744_v51 = vpop.f32.mrb[6].mxu1 }
 0x176   : > { %1535 = vmatmul.mubr.msk.bf16.vlgmr.msra.gmra.mrb[8].mxu0 %vm452_vm5, %v604_v32  ;;  %v1549_v53 = vpop.f32.mrb[7].mxu1 }
 0x177   : > { %1551 = vmatpush3.bf16.msra.mxu0 %v1727_v31  ;;  %1554 = vmatprep.mubr.msk.bf16.mxu0 %vm1956_vm3, %v1955_v0 }
 0x178   : > { %1552 = vmatprep.subr.bf16.mxu0 %v1955_v0 }
 0x17b   : > { %1553 = vmatpush3.bf16.msra.mxu0 %v1728_v33 }
 0x17c   : > { %1558 = vmatprep.subr.bf16.mxu0 %v1955_v0 }
 0x17e   : > { %1555 = vmatmul.mubr.msk.bf16.vlgmr.msra.gmra.mrb[12].mxu0 %vm452_vm5, %v752_v37 }
 0x17f   : > { %1559 = vmatpush3.bf16.msra.mxu0 %v1729_v36  ;;  %1566 = vmatprep.mubr.msk.bf16.mxu0 %vm1956_vm3, %v1955_v0  ;;  %v1749_v36 = vld [vmem:[#allocation11 + $0x80] sm:$0xff]  }
 0x180   : > { %1560 = vmatprep.subr.bf16.mxu0 %v1955_v0 }
 0x183   : > { %1561 = vmatpush3.bf16.msra.mxu0 %v1730_v38  ;;  %v1750_v38 = vld [vmem:[#allocation11 + $0x88] sm:$0xff]  }
 0x184   : > { %1562 = vmatprep.subr.bf16.mxu0 %v1955_v0 }
 0x187   : > { %1563 = vmatpush3.bf16.msra.mxu0 %v1731_v39 }
 0x188   : > { %1564 = vmatprep.subr.bf16.mxu0 %v1955_v0 }
 0x18b   : > { %1565 = vmatpush3.bf16.msra.mxu0 %v1732_v40 }
 0x18c   : > { %1590 = vmatprep.subr.bf16.mxu0 %v1955_v0 }
 0x18e   : > { %1567 = vmatmul.mubr.msk.bf16.vlgmr.msra.gmra.mrb[16].mxu0 %vm457_vm2, %v818_v43  ;;  %v1752_v43 = vld [vmem:[#allocation11 + $0x98] sm:$0xff]  }
 0x18f   : > { %1606 = vmatprep.mubr.msk.bf16.mxu0 %vm1956_vm3, %v1955_v0  ;;  %1591 = vmatpush3.bf16.msra.mxu0 %v1734_v55 }
 0x190   : > { %1592 = vmatprep.subr.bf16.mxu0 %v1955_v0 }
 0x193   : > { %1593 = vmatpush3.bf16.msra.mxu0 %v1736_v57 }
 0x194   : > { %1594 = vmatprep.subr.bf16.mxu0 %v1955_v0 }
 0x197   : > { %1595 = vmatpush3.bf16.msra.mxu0 %v1738_v58 }
 0x198   : > { %1596 = vmatprep.subr.bf16.mxu0 %v1955_v0 }
 0x19b   : > { %1597 = vmatpush3.bf16.msra.mxu0 %v1740_v61 }
 0x19c   : > { %1598 = vmatprep.subr.bf16.mxu0 %v1955_v0 }
 0x19f   : > { %1599 = vmatpush3.bf16.msra.mxu0 %v1742_v63 }
 0x1a0   : > { %1600 = vmatprep.subr.bf16.mxu0 %v1955_v0 }
 0x1a3   : > { %1601 = vmatpush3.bf16.msra.mxu0 %v1744_v2 }
 0x1a4   : > { %1602 = vmatprep.subr.bf16.mxu0 %v1955_v0 }
 0x1a7   : > { %1603 = vmatpush3.bf16.msra.mxu0 %v1746_v3 }
 0x1a8   : > { %1604 = vmatprep.subr.bf16.mxu0 %v1955_v0 }
 0x1ab   : > { %1605 = vmatpush3.bf16.msra.mxu0 %v1748_v4 }
 0x241   : > { %v595_v5 = vpop.f32.mrb[4].mxu0 }
 0x242   : > { %v596_v6 = vadd.f32 %v595_v5, %v539_v44  ;;  %v1528_v7 = vpop.f32.mrb[5].mxu0  ;;  %v1753_v44 = vld [vmem:[#allocation11 + $0xa0] sm:$0xff]  }
 0x243   : > { %v598_v8 = vpop.f32.mrb[6].mxu0 }
 0x244   : > { %v599_v9 = vadd.f32 %v598_v8, %v542_v46  ;;  %v1529_v10 = vpop.f32.mrb[7].mxu0  ;;  %v1755_v46 = vld [vmem:[#allocation11 + $0xb0] sm:$0xff]  }
 0x249   : > { %v659_v11 = vpop.f32.mrb[8].mxu0 }
 0x24a   : > { %v666_v12 = vadd.f32 %v659_v11, %v596_v6  ;;  %v1536_v13 = vpop.f32.mrb[9].mxu0 }
 0x24b   : > { %v662_v14 = vpop.f32.mrb[10].mxu0 }
 0x24c   : > { %v667_v15 = vadd.f32 %v662_v14, %v599_v9  ;;  %v748_v16 = vadd.f32 %v741_v49, %v666_v12  ;;  %v1537_v17 = vpop.f32.mrb[11].mxu0 }
 0x24e   : > { %v749_v18 = vadd.f32 %v744_v51, %v667_v15 }
 0x251   : > { %v807_v19 = vpop.f32.mrb[12].mxu0 }
 0x252   : > { %v814_v20 = vadd.f32 %v807_v19, %v748_v16  ;;  %v1556_v21 = vpop.f32.mrb[13].mxu0 }
 0x253   : > { %v810_v22 = vpop.f32.mrb[14].mxu0 }
 0x254   : > { %v815_v23 = vadd.f32 %v810_v22, %v749_v18  ;;  %v1557_v24 = vpop.f32.mrb[15].mxu0 }
 0x261   : > { %v889_v25 = vpop.f32.mrb[16].mxu0 }
 0x262   : > { %v896_v27 = vadd.f32 %v889_v25, %v814_v20  ;;  %v1568_v28 = vpop.f32.mrb[17].mxu0 }
 0x263   : > { %v892_v29 = vpop.f32.mrb[18].mxu0 }
 0x264   : > { %v903_v30 = vadd.f32 %v1418_v26, %v896_v27  ;;  %v897_v31 = vadd.f32 %v892_v29, %v815_v23  ;;  %v1569_v32 = vpop.f32.mrb[19].mxu0 }
 0x266   : > { %v905_v33 = vmax.f32 %v903_v30, 0.0  ;;  %v904_v34 = vadd.f32 %v1418_v26, %v897_v31 }
 0x268   : > { %907 = vst [vmem:[#allocation4 + $0x1] sm:$0xff] %v905_v33  ;;  %v906_v35 = vmax.f32 %v904_v34, 0.0 }
 0x26a   : > { %908 = vst [vmem:[#allocation4 + $0x9] sm:$0xff] %v906_v35  ;;  %v930_v37 = vpack.c.bf16 %v906_v35, %v905_v33 }
 0x26c   : > { %1587 = vmatmul.mubr.bf16.vlgmr.msra.gmra.mrb[8].mxu1 %v930_v37 }
 0x26d   : > { %1611 = vmatpush3.bf16.msra.mxu1 %v1749_v36  ;;  %1626 = vmatprep.mubr.msk.bf16.mxu1 %vm1956_vm3, %v1955_v0 }
 0x26e   : > { %1612 = vmatprep.subr.bf16.mxu1 %v1955_v0 }
 0x26f   : > { %v909_v39 = vld [vmem:[#allocation4] sm:$0xff] }
 0x271   : > { %v910_v40 = vld [vmem:[#allocation4 + $0x8] sm:$0xff]  ;;  %1613 = vmatpush3.bf16.msra.mxu1 %v1750_v38 }
 0x272   : > { %v911_v42 = vpack.c.bf16 %v910_v40, %v909_v39  ;;  %1614 = vmatprep.subr.bf16.mxu1 %v1955_v0  ;;  %v1126_v48 = vld [vmem:[#allocation4 + $0x2] sm:$0xff]  ;;  %v1127_v49 = vld [vmem:[#allocation4 + $0xa] sm:$0xff] }
 0x273   : > { %v1128_v50 = vpack.c.bf16 %v1127_v49, %v1126_v48 }
 0x274   : > { %1607 = vmatmul.mubr.bf16.vlgmr.msra.gmra.mrb[20].mxu0 %v911_v42 }
 0x275   : > { %1615 = vmatpush3.bf16.msra.mxu1 %v1751_v41 }
 0x276   : > { %1616 = vmatprep.subr.bf16.mxu1 %v1955_v0 }
 0x279   : > { %1617 = vmatpush3.bf16.msra.mxu1 %v1752_v43 }
 0x27a   : > { %1618 = vmatprep.subr.bf16.mxu1 %v1955_v0 }
 0x27d   : > { %1619 = vmatpush3.bf16.msra.mxu1 %v1753_v44 }
 0x27e   : > { %1620 = vmatprep.subr.bf16.mxu1 %v1955_v0 }
 0x281   : > { %1621 = vmatpush3.bf16.msra.mxu1 %v1754_v45 }
 0x282   : > { %1622 = vmatprep.subr.bf16.mxu1 %v1955_v0 }
 0x285   : > { %1623 = vmatpush3.bf16.msra.mxu1 %v1755_v46 }
 0x286   : > { %1624 = vmatprep.subr.bf16.mxu1 %v1955_v0  ;;  %v1443_v0 = vld [vmem:[%s2375_s6 + $0x1] ss:$0 sm:$0xff] }
 0x289   : > { %1625 = vmatpush3.bf16.msra.mxu1 %v1756_v47 }
 0x28c   : > { %1627 = vmatmul.mubr.bf16.vlgmr.msra.gmra.mrb[12].mxu1 %v1128_v50 }
 0x33f   : > { %v1030_v51 = vpop.f32.mrb[8].mxu1 }
 0x340   : > { %v1588_v52 = vpop.f32.mrb[9].mxu1 }
 0x341   : > { %v1033_v53 = vpop.f32.mrb[10].mxu1 }
 0x342   : > { %v1589_v54 = vpop.f32.mrb[11].mxu1 }
 0x347   : > { %v1119_v55 = vpop.f32.mrb[20].mxu0 }
 0x348   : > { %v1120_v56 = vadd.f32 %v1119_v55, %v1030_v51  ;;  %v1608_v57 = vpop.f32.mrb[21].mxu0 }
 0x349   : > { %v1122_v58 = vpop.f32.mrb[22].mxu0 }
 0x34a   : > { %v1123_v59 = vadd.f32 %v1122_v58, %v1033_v53  ;;  %v1609_v60 = vpop.f32.mrb[23].mxu0 }
 0x35f   : > { %v1228_v61 = vpop.f32.mrb[12].mxu1 }
 0x360   : > { %v1235_v62 = vadd.f32 %v1228_v61, %v1120_v56  ;;  %v1628_v63 = vpop.f32.mrb[13].mxu1 }
 0x361   : > { %v1231_v1 = vpop.f32.mrb[14].mxu1 }
 0x362   : > { %v1242_v2 = vadd.f32 %v1443_v0, %v1235_v62  ;;  %v1236_v3 = vadd.f32 %v1231_v1, %v1123_v59  ;;  %v1629_v4 = vpop.f32.mrb[15].mxu1 }
 0x364   : > { %v1244_v5 = vmax.f32 %v1242_v2, 0.0  ;;  %v1243_v6 = vadd.f32 %v1443_v0, %v1236_v3 }
 0x366   : > { %1246 = vst [vmem:[%s353_s30] sm:$0xff] %v1244_v5  ;;  %v1245_v7 = vmax.f32 %v1243_v6, 0.0 }
 0x368   : > { %1247 = vst [vmem:[%s353_s30 + $0x8] sm:$0xff] %v1245_v7 }
 0x369   : > { %1884 = shalt.err (!%p1881_p9)
}
 0x36a   : > { %s1885_s8 = scalar_lea.hbm %s2325_s14, 256  ;;  %s1889_s20 = scalar_lea.hbm %s2376_s7, 512 }
 0x36b   : > { %p1886_p0 = scmp.ne.s32.totalorder %s2325_s14, %s1885_s8  ;;  %p1890_p13 = scmp.lt.u32.totalorder %s2325_s14, %s2376_s7 }
 0x36c   : > { %p1891_p6 = scmp.lt.u32.totalorder %s1889_s20, %s1885_s8  ;;  %p1893_p3 = scmp.lt.u32.totalorder %s1885_s8, %s2325_s14 }
 0x36d   : > { %p1887_p11 = pnand %p1886_p0, %p2154_p5 }
 0x36e   : > { %p1892_p10 = por %p1891_p6, %p1890_p13 }
 0x36f   : > { %p1888_p8 = pneg %p1887_p11 }
 0x370   : > { %p1894_p7 = por %p1893_p3, %p1892_p10 }
 0x372   : > { %p1895_p12 = pnand %p1894_p7, %p1888_p8 }
 0x374   : > { %1898 = shalt.err (!%p1895_p12)
}
 0x375   : > { %s1958_s10 = smov 128   ;;  %s1959_s11 = smov 8  }
 0x376   : > { %1644 = dma.vmem_to_hbm [thread:$0]  (%p2154_p5), %s2320_s9, 256, %s2325_s14, %s1249_s16, %s1958_s10, %s1958_s10, %s1959_s11  }
 0x377 PF: > { %s2396_s15 = sld [smem:[#allocation18_spill]]  ;;  %s1277_s28 = sand.u32 1, %s1933_s24  }
 0x378   : > { %p2398_p2 = scmp.ge.s32.totalorder %s1945_s27, 2  ;;  %s1278_s29 = scalar_lea.sflag [#allocation7], %s1277_s28 }
 0x37d   : > { %p2397_p1 = scmp.ne.s32.totalorder %s2396_s15, 0 }
 0x37f   : > { %p1661_p4 = pnand %p2398_p2, %p2397_p1 }
 0x381   : > { %1928 = dma.done.wait (!%p1661_p4), %s1278_s29, 256  }
 0x382   : > { %1930 = vsyncadd (!%p1661_p4), %s1278_s29, 4294967040  ;;  %p22_p9 = scmp.ge.s32.totalorder %s2140_s22, 4   ;;  %s2399_s24 = smov %s1937_s25 }
 0x383   : > { %s2400_s25 = smov %s1941_s26  ;;  %s2401_s26 = smov %s2150_s18 }
 0x384   : > { %s2402_s27 = smov %s2140_s22  ;;  %24 = sbr.rel (!%p22_p9) target bundleno = 7 (0x7), region = 114 }
 0x38b   :  { %1283 = vsyncpa [#allocation6], 1 }
 0x38c   :  { %1285 = vsyncpa [#allocation6 + $0x1], 1 }
 0x38d   :  { %1286 = vsyncpa [#allocation9], 1 }
 0x38e   :  { %1287 = vsyncpa [#allocation12], 1 }
 0x38f   :  { %1288 = vsyncpa [#allocation7], 1 }
 0x390   :  { %1290 = vsyncpa [#allocation7 + $0x1], 1 }

</bundles_post_ra>
